<compile_context>
chip_gen: v5e
topology: v5e:2x2
jax: 0.10.0
libtpu: 0.0.40
codegen_flags: <defaults>
</compile_context>

<pallas_src>
import functools

import numpy as np
import jax
import jax.numpy as jnp
from jax.experimental import pallas as pl
from jax.experimental.pallas import tpu as pltpu

# Make the pure-JAX reference and the in-kernel dots use full f32 precision so
# the correctness check below is meaningful and tight.
jax.config.update("jax_default_matmul_precision", "highest")

LOG_2PI = float(np.log(2.0 * np.pi))


def mdn_model_kernel(inp_ref, x_ref, w1_ref, b1_ref, w2_ref, b2_ref, out_ref,
                     *, n_mixtures, n_inp, eps):
    """Fused Model.forward for one batch tile (batch on the lane axis).

    inp_ref : (n_inp, TB)     x_ref  : (1, TB)
    w1_ref  : (n_hid, n_inp)  b1_ref : (n_hid, 1)
    w2_ref  : (3M, n_hid)     b2_ref : (3M, 1)
    out_ref : (1, TB)   per-example negative mixture log-likelihood
    """
    M = n_mixtures

    # ---- first Linear + tanh:  h^T = tanh(W1 @ inp^T + b1) -> (n_hid, TB) ----
    if n_inp == 1:
        # Degenerate K=1 contraction: a broadcast multiply on the VPU is both
        # exact and cheaper than an MXU push.
        pre = w1_ref[...] * inp_ref[...] + b1_ref[...]
    else:
        pre = jnp.dot(w1_ref[...], inp_ref[...],
                      preferred_element_type=jnp.float32) + b1_ref[...]
    h = jnp.tanh(pre)

    # ---- fused MDN head projection (single MXU matmul): (3M, TB) ----
    p = jnp.dot(w2_ref[...], h, preferred_element_type=jnp.float32) + b2_ref[...]
    logits = p[:M, :]
    mu = p[M:2 * M, :]
    log_sig = p[2 * M:, :]

    # ---- log-softmax over the mixture (sublane) axis ----
    lmax = jnp.max(logits, axis=0, keepdims=True)
    shifted = logits - lmax
    log_pi = shifted - jnp.log(jnp.sum(jnp.exp(shifted), axis=0, keepdims=True))

    # ---- Gaussian log-likelihood per component ----
    x_row = x_ref[...]                      # (1, TB), broadcasts over mixtures
    if eps == 0.0:
        # sigma = exp(log_sig):  log(sigma) == log_sig, 1/sigma == exp(-log_sig)
        inv_sigma = jnp.exp(-log_sig)
        log_sigma = log_sig
    else:
        sigma = jnp.exp(log_sig) + eps
        inv_sigma = pl.reciprocal(sigma, approx=True)   # EUP slot, nearly free
        log_sigma = jnp.log(sigma)
    z = (x_row - mu) * inv_sigma
    log_normal = -0.5 * (z * z) - (0.5 * LOG_2PI) - log_sigma
    lw = log_normal + log_pi

    # ---- stable log-sum-exp over the mixture (sublane) axis ----
    m = jnp.max(lw, axis=0, keepdims=True)
    mix_ll = jnp.log(jnp.sum(jnp.exp(lw - m), axis=0, keepdims=True)) + m

    out_ref[...] = -mix_ll                  # lane-dense (1, TB) store


def model_forward(inp, x, w1, b1, w2, b2, n_mixtures, eps=0.0, block_b=512):
    """Pallas wrapper for Model.forward.

    inp: (B, n_inp), x: (B,)
    w1: (n_hid, n_inp), b1: (n_hid,)        -- first Linear (PyTorch layout)
    w2: (3*M, n_hid),   b2: (3*M,)          -- GaussianMixture1d.lin
    Returns (mean_nll_scalar, per_example_nll).
    """
    B, n_inp = inp.shape
    n_hid = w1.shape[0]
    M = n_mixtures
    assert w1.shape == (n_hid, n_inp) and b1.shape == (n_hid,)
    assert w2.shape == (3 * M, n_hid) and b2.shape == (3 * M,)

    # Batch tile: full batch if small, else 512 lanes (multiple of 128).
    TB = B if B <= block_b else block_b
    n_tiles = pl.cdiv(B, TB)
    pad_b = n_tiles * TB

    f32 = jnp.float32
    # Batch-in-lanes layout.  For n_inp == 1 this is a free reshape.
    # TODO(synk): for repeated calls, hoist these casts/reshapes to param init.
    inp_t = inp.astype(f32).reshape(1, B) if n_inp == 1 else inp.astype(f32).T
    x_t = x.astype(f32).reshape(1, B)
    w1c = w1.astype(f32)                         # native (n_hid, n_inp)
    b1c = b1.astype(f32).reshape(n_hid, 1)
    w2c = w2.astype(f32)                         # native (3M, n_hid), fused heads
    b2c = b2.astype(f32).reshape(3 * M, 1)

    kernel = functools.partial(mdn_model_kernel,
                               n_mixtures=M, n_inp=n_inp, eps=float(eps))

    cost = pl.CostEstimate(
        flops=int(2 * B * (n_inp * n_hid + n_hid * 3 * M) + 12 * B * M),
        transcendentals=int(B * (n_hid + 3 * M + 2)),
        bytes_accessed=int(4 * (B * n_inp + 2 * B
                                + n_hid * (n_inp + 1) + 3 * M * (n_hid + 1))),
    )

    out = pl.pallas_call(
        kernel,
        out_shape=jax.ShapeDtypeStruct((1, pad_b), f32),
        grid=(n_tiles,),
        in_specs=[
            pl.BlockSpec((n_inp, TB), lambda i: (0, i)),      # inp^T tile
            pl.BlockSpec((1, TB), lambda i: (0, i)),          # x tile
            pl.BlockSpec((n_hid, n_inp), lambda i: (0, 0)),   # W1 (resident)
            pl.BlockSpec((n_hid, 1), lambda i: (0, 0)),       # b1
            pl.BlockSpec((3 * M, n_hid), lambda i: (0, 0)),   # W2 (fused heads)
            pl.BlockSpec((3 * M, 1), lambda i: (0, 0)),       # b2
        ],
        out_specs=pl.BlockSpec((1, TB), lambda i: (0, i)),    # lane-dense NLL
        compiler_params=pltpu.CompilerParams(
            dimension_semantics=("parallel",),
            vmem_limit_bytes=32 * 1024 * 1024,
        ),
        cost_estimate=cost,
    )(inp_t, x_t, w1c, b1c, w2c, b2c)

    nll = out[0, :B]
    return jnp.mean(nll), nll


def _reference_nll(inp, x, w1, b1, w2, b2, n_mixtures, eps=0.0):
    """Pure-JAX reference mirroring the PyTorch Model.forward (per-example NLL)."""
    M = n_mixtures
    h = jnp.tanh(inp @ w1.T + b1)
    p = h @ w2.T + b2
    pi = jax.nn.softmax(p[:, :M], axis=1)
    mu = p[:, M:2 * M]
    sigma = jnp.exp(p[:, 2 * M:]) + eps
    log_normal = -0.5 * ((x[:, None] - mu) / sigma) ** 2 - 0.5 * LOG_2PI - jnp.log(sigma)
    lw = log_normal + jnp.log(pi)
    maxes = jnp.max(lw, axis=1)
    mll = jnp.log(jnp.sum(jnp.exp(lw - maxes[:, None]), axis=1)) + maxes
    return -mll


if __name__ == "__main__":
    # Module defaults: n_inp=1, n_hid=24, n_mixtures=24.  Batch of 256 so the
    # kernel actually exercises the batch grid (two 128-lane tiles).
    B, n_inp, n_hid, n_mixtures = 256, 1, 24, 24
    eps = 0.0

    key = jax.random.PRNGKey(0)
    k1, k2, k3, k4, k5, k6 = jax.random.split(key, 6)

    # PyTorch-style uniform Linear init.
    bound1 = 1.0 / np.sqrt(n_inp)
    w1 = jax.random.uniform(k1, (n_hid, n_inp), jnp.float32, -bound1, bound1)
    b1 = jax.random.uniform(k2, (n_hid,), jnp.float32, -bound1, bound1)
    bound2 = 1.0 / np.sqrt(n_hid)
    w2 = jax.random.uniform(k3, (3 * n_mixtures, n_hid), jnp.float32, -bound2, bound2)
    b2 = jax.random.uniform(k4, (3 * n_mixtures,), jnp.float32, -bound2, bound2)

    inp = jax.random.normal(k5, (B, n_inp), jnp.float32)
    x = jax.random.normal(k6, (B,), jnp.float32)

    mean_nll, nll = model_forward(inp, x, w1, b1, w2, b2, n_mixtures, eps, block_b=128)
    mean_nll = jax.block_until_ready(mean_nll)
    nll = jax.block_until_ready(nll)

    ref_nll = _reference_nll(inp, x, w1, b1, w2, b2, n_mixtures, eps)
    ref_mean = jnp.mean(ref_nll)

    assert nll.shape == (B,)
    np.testing.assert_allclose(np.asarray(nll), np.asarray(ref_nll), rtol=1e-4, atol=1e-4)
    np.testing.assert_allclose(float(mean_nll), float(ref_mean), rtol=1e-4, atol=1e-4)

    print("KERNEL_OK")
</pallas_src>

<mosaic_0001>
module attributes {stable_mosaic.version = 11 : i64} {
  func.func @mdn_model_kernel(%arg0: i32, %arg1: memref<1x128xf32, #tpu.memory_space<vmem>>, %arg2: memref<1x128xf32, #tpu.memory_space<vmem>>, %arg3: memref<24x1xf32, #tpu.memory_space<vmem>>, %arg4: memref<24x1xf32, #tpu.memory_space<vmem>>, %arg5: memref<72x24xf32, #tpu.memory_space<vmem>>, %arg6: memref<72x1xf32, #tpu.memory_space<vmem>>, %arg7: memref<1x128xf32, #tpu.memory_space<vmem>>) attributes {dimension_semantics = [#tpu.dimension_semantics<parallel>], iteration_bounds = array<i64: 2>, scalar_prefetch = 0 : i64, scratch_operands = 0 : i64, tpu.core_type = #tpu.core_type<tc>, window_params = [{transform_indices = @transform_0, window_bounds = array<i64: 1, 128>}, {transform_indices = @transform_1, window_bounds = array<i64: 1, 128>}, {pipeline_mode = #tpu.pipeline_mode<synchronous>, transform_indices = @transform_2, window_bounds = array<i64: 24, 1>}, {pipeline_mode = #tpu.pipeline_mode<synchronous>, transform_indices = @transform_3, window_bounds = array<i64: 24, 1>}, {pipeline_mode = #tpu.pipeline_mode<synchronous>, transform_indices = @transform_4, window_bounds = array<i64: 72, 24>}, {pipeline_mode = #tpu.pipeline_mode<synchronous>, transform_indices = @transform_5, window_bounds = array<i64: 72, 1>}, {transform_indices = @transform_6, window_bounds = array<i64: 1, 128>}]} {
    %c0 = arith.constant 0 : index
    %c0_0 = arith.constant 0 : index
    %0 = vector.load %arg3[%c0, %c0_0] : memref<24x1xf32, #tpu.memory_space<vmem>>, vector<24x1xf32>
    %c0_1 = arith.constant 0 : index
    %c0_2 = arith.constant 0 : index
    %1 = vector.load %arg1[%c0_1, %c0_2] : memref<1x128xf32, #tpu.memory_space<vmem>>, vector<1x128xf32>
    %2 = vector.broadcast %0 : vector<24x1xf32> to vector<24x128xf32>
    %3 = vector.broadcast %1 : vector<1x128xf32> to vector<24x128xf32>
    %4 = arith.mulf %2, %3 : vector<24x128xf32>
    %c0_3 = arith.constant 0 : index
    %c0_4 = arith.constant 0 : index
    %5 = vector.load %arg4[%c0_3, %c0_4] : memref<24x1xf32, #tpu.memory_space<vmem>>, vector<24x1xf32>
    %6 = vector.broadcast %5 : vector<24x1xf32> to vector<24x128xf32>
    %7 = arith.addf %4, %6 : vector<24x128xf32>
    %8 = math.tanh %7 : vector<24x128xf32>
    %c0_5 = arith.constant 0 : index
    %c0_6 = arith.constant 0 : index
    %9 = vector.load %arg5[%c0_5, %c0_6] : memref<72x24xf32, #tpu.memory_space<vmem>>, vector<72x24xf32>
    %cst = arith.constant dense<0.000000e+00> : vector<72x128xf32>
    %10 = tpu.matmul %9, %8, %cst {dimension_numbers = #tpu.dot_dimension_numbers<[1], [0], [0], [1], [0, 0, 1, 1], [], []>, precision = #tpu.contract_precision<fp32>} : vector<72x24xf32>, vector<24x128xf32>, vector<72x128xf32> -> vector<72x128xf32>
    %c0_7 = arith.constant 0 : index
    %c0_8 = arith.constant 0 : index
    %11 = vector.load %arg6[%c0_7, %c0_8] : memref<72x1xf32, #tpu.memory_space<vmem>>, vector<72x1xf32>
    %12 = vector.broadcast %11 : vector<72x1xf32> to vector<72x128xf32>
    %13 = arith.addf %10, %12 : vector<72x128xf32>
    %14 = vector.extract_strided_slice %13 {offsets = [0, 0], sizes = [24, 128], strides = [1, 1]} : vector<72x128xf32> to vector<24x128xf32>
    %15 = vector.extract_strided_slice %13 {offsets = [24, 0], sizes = [24, 128], strides = [1, 1]} : vector<72x128xf32> to vector<24x128xf32>
    %16 = vector.extract_strided_slice %13 {offsets = [48, 0], sizes = [24, 128], strides = [1, 1]} : vector<72x128xf32> to vector<24x128xf32>
    %cst_9 = arith.constant dense<0xFF800000> : vector<128xf32>
    %17 = vector.multi_reduction <maximumf>, %14, %cst_9 [0] : vector<24x128xf32> to vector<128xf32>
    %18 = vector.shape_cast %17 : vector<128xf32> to vector<1x128xf32>
    %19 = vector.broadcast %18 : vector<1x128xf32> to vector<24x128xf32>
    %20 = arith.subf %14, %19 : vector<24x128xf32>
    %21 = math.exp %20 : vector<24x128xf32>
    %cst_10 = arith.constant dense<0.000000e+00> : vector<128xf32>
    %22 = vector.multi_reduction <add>, %21, %cst_10 [0] : vector<24x128xf32> to vector<128xf32>
    %23 = vector.shape_cast %22 : vector<128xf32> to vector<1x128xf32>
    %24 = math.log %23 : vector<1x128xf32>
    %25 = vector.broadcast %24 : vector<1x128xf32> to vector<24x128xf32>
    %26 = arith.subf %20, %25 : vector<24x128xf32>
    %c0_11 = arith.constant 0 : index
    %c0_12 = arith.constant 0 : index
    %27 = vector.load %arg2[%c0_11, %c0_12] : memref<1x128xf32, #tpu.memory_space<vmem>>, vector<1x128xf32>
    %cst_13 = arith.constant 0.000000e+00 : f32
    %28 = vector.broadcast %cst_13 : f32 to vector<24x128xf32>
    %29 = arith.subf %28, %16 : vector<24x128xf32>
    %30 = math.exp %29 : vector<24x128xf32>
    %31 = vector.broadcast %27 : vector<1x128xf32> to vector<24x128xf32>
    %32 = arith.subf %31, %15 : vector<24x128xf32>
    %33 = arith.mulf %32, %30 : vector<24x128xf32>
    %34 = arith.mulf %33, %33 : vector<24x128xf32>
    %cst_14 = arith.constant -5.000000e-01 : f32
    %35 = vector.broadcast %cst_14 : f32 to vector<24x128xf32>
    %36 = arith.mulf %35, %34 : vector<24x128xf32>
    %cst_15 = arith.constant 0.918938517 : f32
    %37 = vector.broadcast %cst_15 : f32 to vector<24x128xf32>
    %38 = arith.subf %36, %37 : vector<24x128xf32>
    %39 = arith.subf %38, %16 : vector<24x128xf32>
    %40 = arith.addf %39, %26 : vector<24x128xf32>
    %cst_16 = arith.constant dense<0xFF800000> : vector<128xf32>
    %41 = vector.multi_reduction <maximumf>, %40, %cst_16 [0] : vector<24x128xf32> to vector<128xf32>
    %42 = vector.shape_cast %41 : vector<128xf32> to vector<1x128xf32>
    %43 = vector.broadcast %42 : vector<1x128xf32> to vector<24x128xf32>
    %44 = arith.subf %40, %43 : vector<24x128xf32>
    %45 = math.exp %44 : vector<24x128xf32>
    %cst_17 = arith.constant dense<0.000000e+00> : vector<128xf32>
    %46 = vector.multi_reduction <add>, %45, %cst_17 [0] : vector<24x128xf32> to vector<128xf32>
    %47 = vector.shape_cast %46 : vector<128xf32> to vector<1x128xf32>
    %48 = math.log %47 : vector<1x128xf32>
    %49 = arith.addf %48, %42 : vector<1x128xf32>
    %cst_18 = arith.constant 0.000000e+00 : f32
    %50 = vector.broadcast %cst_18 : f32 to vector<1x128xf32>
    %51 = arith.subf %50, %49 : vector<1x128xf32>
    %c0_19 = arith.constant 0 : index
    %c0_20 = arith.constant 0 : index
    %52 = vector.load %arg7[%c0_19, %c0_20] : memref<1x128xf32, #tpu.memory_space<vmem>>, vector<1x128xf32>
    tpu.vector_store %arg7[%c0_19, %c0_20], %51 {strides = array<i32>} : memref<1x128xf32, #tpu.memory_space<vmem>>, vector<1x128xf32>,
    return
  }
  func.func @transform_0(%arg0: i32) -> (i32, i32) {
    %c0_i32 = arith.constant 0 : i32
    %c0_i32_0 = arith.constant 0 : i32
    return %c0_i32, %arg0 : i32, i32
  }
  func.func @transform_1(%arg0: i32) -> (i32, i32) {
    %c0_i32 = arith.constant 0 : i32
    %c0_i32_0 = arith.constant 0 : i32
    return %c0_i32, %arg0 : i32, i32
  }
  func.func @transform_2(%arg0: i32) -> (i32, i32) {
    %c0_i32 = arith.constant 0 : i32
    %c0_i32_0 = arith.constant 0 : i32
    %c0_i32_1 = arith.constant 0 : i32
    return %c0_i32, %c0_i32_0 : i32, i32
  }
  func.func @transform_3(%arg0: i32) -> (i32, i32) {
    %c0_i32 = arith.constant 0 : i32
    %c0_i32_0 = arith.constant 0 : i32
    %c0_i32_1 = arith.constant 0 : i32
    return %c0_i32, %c0_i32_0 : i32, i32
  }
  func.func @transform_4(%arg0: i32) -> (i32, i32) {
    %c0_i32 = arith.constant 0 : i32
    %c0_i32_0 = arith.constant 0 : i32
    %c0_i32_1 = arith.constant 0 : i32
    return %c0_i32, %c0_i32_0 : i32, i32
  }
  func.func @transform_5(%arg0: i32) -> (i32, i32) {
    %c0_i32 = arith.constant 0 : i32
    %c0_i32_0 = arith.constant 0 : i32
    %c0_i32_1 = arith.constant 0 : i32
    return %c0_i32, %c0_i32_0 : i32, i32
  }
  func.func @transform_6(%arg0: i32) -> (i32, i32) {
    %c0_i32 = arith.constant 0 : i32
    %c0_i32_0 = arith.constant 0 : i32
    return %c0_i32, %arg0 : i32, i32
  }
}

</mosaic_0001>

<bundles_post_ra>
// kernel: tpu_custom_call.1
= control target key start
LH: loop header
LB: loop body
LE: loop exit
PB: predicated region body
PF: predicated region fallthrough
CT: control target
= control target key end

     0   :  { %11 = vsyncpa [#allocation3], 0  ;;  %s1517_s0 = inlined_call_operand.vmem [shape: f32[1,256], index: 0, kind: input, shape index: {}]   ;;  %s1518_s1 = inlined_call_operand.vmem [shape: f32[1,256], index: 1, kind: input, shape index: {}]   ;;  %s1519_s2 = inlined_call_operand.vmem [shape: f32[24,1], index: 2, kind: input, shape index: {}]   ;;  %s1520_s3 = inlined_call_operand.vmem [shape: f32[24,1], index: 3, kind: input, shape index: {}]   ;;  %s1521_s4 = inlined_call_operand.vmem [shape: f32[72,24], index: 4, kind: input, shape index: {}]   ;;  %s1522_s5 = inlined_call_operand.vmem [shape: f32[72,1], index: 5, kind: input, shape index: {}]   ;;  %s1523_s6 = inlined_call_operand.hbm [shape: f32[1,256], index: 6, kind: output, shape index: {}]  }
   0x1   :  { %13 = vsyncpa [#allocation3 + $0x1], 0  ;;  %s1173_s21 = smov 0   ;;  %s1175_s22 = smov 0  }
   0x2   :  { %s1177_s23 = smov 0   ;;  %s1179_s24 = smov 0  }
   0x3 LB: > { %s1194_s25 = sadd.s32 4294967295, %s1135_s24   ;;  %s985_s26 = sadd.s32 4294967294, %s1135_s24   ;;  %s1135_s24 = sphi %s1179_s24, %s1529_s24   ;;  %s1131_s23 = sphi %s1177_s23, %s1528_s23   ;;  %s1127_s22 = sphi %s1175_s22, %s1527_s22   ;;  %s1123_s21 = sphi %s1173_s21, %s1526_s21  }
   0x4   : > { %s1198_s27 = sadd.s32 1, %s1135_s24   ;;  %s162_s28 = sadd.s32 1, %s1131_s23 }
   0x5   : > { %s159_s29 = ssub.s32 %s1135_s24, %s1198_s27  ;;  %p172_p0 = scmp.ne.s32.totalorder %s1131_s23, %s1127_s22 }
   0x6   : > { %p160_p1 = scmp.eq.s32.totalorder %s159_s29, 0  ;;  %p173_p2 = scmp.eq.s32.totalorder %s1194_s25, 1 }
   0x7   : > { %p178_p3 = scmp.ne.s32.totalorder %s1127_s22, %s1123_s21  ;;  %p179_p4 = scmp.eq.s32.totalorder %s985_s26, 1 }
   0x8   : > { %s1209_s30 = scalar_select %p160_p1, %s1131_s23, %s162_s28  }
   0x9   : > { %p1211_p5 = por %p173_p2, %p172_p0  ;;  %p1215_p6 = por %p179_p4, %p178_p3 }
   0xa   : > { %p988_p7 = scmp.ge.s32.totalorder %s1135_s24, 1  ;;  %p221_p8 = scmp.lt.s32.totalorder %s1135_s24, 3 }
   0xc   : > { %p222_p9 = pnand %p988_p7, %p221_p8 }
   0xd   : > { %p251_p10 = scmp.lt.s32.totalorder (!%p222_p9), %s1194_s25, 1  ;;  %s920_s12 = scalar_lea.hbm (!%p222_p9), %s1523_s6, %s1194_s25 }
   0xe   : > { %225 = sbr.rel (%p222_p9) target bundleno = 486 (0x1e6), region = 44  ;;  %s924_s16 = sshll.u32 (!%p222_p9), %s920_s12, 4  ;;  %s925_s16 = int_to_ptr.hbm [resolvable:$true] %s924_s16 }
   0xf   : > { %s1087_s19 = sshra.s32 (!%p222_p9), %s925_s16, 4  ;;  %s1093_s26 = scalar_lea.hbm (!%p222_p9), %s1523_s6, 2  ;;  %s1088_s19 = int_to_ptr.hbm [resolvable:$true] %s1087_s19 }
  0x10   : > { %s1089_s20 = scalar_lea.hbm (!%p222_p9), %s1088_s19, 1  ;;  %p1094_p0 = scmp.lt.s32.totalorder (!%p222_p9), %s1088_s19, %s1523_s6 }
  0x11   : > { %p1090_p11 = scmp.ne.s32.totalorder (!%p222_p9), %s1088_s19, %s1089_s20  ;;  %p1095_p1 = scmp.lt.s32.totalorder (!%p222_p9), %s1093_s26, %s1089_s20 }
  0x13   : > { %v283_v0 = vld [vmem:[%s1520_s3 + $0x8] sm:$0xff]  ;;  %v284_v1 = vld [vmem:[%s1520_s3 + $0x10] sm:$0xff]  ;;  %v1137_v3 = vmov 0   ;;  %s1232_s15 = scalar_select %p251_p10, %s1194_s25, 1  ;;  %v282_v4 = vld [vmem:[%s1520_s3] sm:$0xff]  ;;  %vm369_vm0 = vcmask 195584  }
  0x14   : > { %v259_v2 = vld [vmem:[%s1519_s2 + $0x10] sm:$0xff]  ;;  %1042 = vset.pattern.permute.xlu2 %v1137_v3  ;;  %1041 = vset.pattern.permute.xlu1 %v1137_v3  ;;  %v258_v5 = vld [vmem:[%s1519_s2 + $0x8] sm:$0xff]  ;;  %v257_v6 = vld [vmem:[%s1519_s2] sm:$0xff]  ;;  %p1091_p12 = pnand %p1090_p11, %p1211_p5  ;;  %p1096_p2 = por %p1095_p1, %p1094_p0 }
  0x15   : > { %1040 = vset.pattern.permute.xlu0 %v1137_v3  ;;  %292 = vperm.xlu2 %1042, %v283_v0   ;;  %s253_s18 = scalar_lea.vmem %s1517_s0, %s1232_s15  ;;  %v317_v7 = vld [vmem:[%s1522_s5 + $0x10] sm:$0xff]  ;;  %v315_v8 = vld [vmem:[%s1522_s5] sm:$0xff]  ;;  %v316_v9 = vld [vmem:[%s1522_s5 + $0x8] sm:$0xff]  ;;  %s256_s28 = scalar_lea.vmem %s1518_s1, %s1232_s15 }
  0x16   : > { %297 = vperm.xlu1 %1041, %v284_v1   ;;  %273 = vperm.xlu0 %1040, %v259_v2   ;;  %v323_v10 = vld [vmem:[%s1522_s5 + $0x40] sm:$0xff]  ;;  %v321_v11 = vld [vmem:[%s1522_s5 + $0x30] sm:$0xff]  ;;  %v322_v12 = vld [vmem:[%s1522_s5 + $0x38] sm:$0xff]  ;;  %s249_s15 = sand.u32 1, %s1127_s22   ;;  %p1092_p13 = pneg %p1091_p12 }
  0x17   : > { %v320_v13 = vld [vmem:[%s1522_s5 + $0x28] sm:$0xff]  ;;  %v318_v14 = vld [vmem:[%s1522_s5 + $0x18] sm:$0xff]  ;;  %v319_v15 = vld [vmem:[%s1522_s5 + $0x20] sm:$0xff]  ;;  %s250_s13 = scalar_lea.vmem [#allocation2], %s249_s15  ;;  %s912_s17 = scalar_lea.sflag [#allocation3], %s249_s15 }
  0x18   : > { %v1043_v16 = vld [vmem:[%s253_s18] ss:$0 sm:$0xff]  ;;  %v311_v19 = vld [vmem:[%s1521_s4 + $0x28] sm:$0xff]  ;;  %v312_v32 = vld [vmem:[%s1521_s4 + $0x30] sm:$0xff]  ;;  %s922_s14 = sshll.u32 %s250_s13, 4  ;;  %p1097_p3 = pnand %p1096_p2, %p1092_p13  ;;  %s923_s14 = int_to_ptr.vmem [resolvable:$true] %s922_s14 }
  0x19   : > { %v306_v17 = vld [vmem:[%s1521_s4] sm:$0xff]  ;;  %v386_v24 = vsel %vm369_vm0, %v311_v19, 0  ;;  %v307_v28 = vld [vmem:[%s1521_s4 + $0x8] sm:$0xff]  ;;  %v389_v41 = vsel %vm369_vm0, %v312_v32, 0  ;;  %v308_v48 = vld [vmem:[%s1521_s4 + $0x10] sm:$0xff] }
  0x1a   : > { %v371_v23 = vsel %vm369_vm0, %v306_v17, 0  ;;  %v1284_v27 = vand.u32 4294901760, %v386_v24  ;;  %v374_v37 = vsel %vm369_vm0, %v307_v28, 0  ;;  %v1309_v47 = vand.u32 4294901760, %v389_v41  ;;  %v313_v51 = vld [vmem:[%s1521_s4 + $0x38] sm:$0xff] }
  0x1b   : > { %v1282_v26 = vand.u32 4294901760, %v371_v23  ;;  %v1304_v45 = vand.u32 4294901760, %v374_v37  ;;  %v377_v56 = vsel %vm369_vm0, %v308_v48, 0  ;;  %v392_v58 = vsel %vm369_vm0, %v313_v51, 0 }
  0x1c   : > { %v1296_v35 = vsub.f32 %v386_v24, %v1284_v27  ;;  %v1327_v55 = vsub.f32 %v389_v41, %v1309_v47  ;;  %v1334_v2 = vand.u32 4294901760, %v377_v56 }
  0x1d   : > { %287 = vperm.xlu2 %1042, %v282_v4   ;;  %v1290_v31 = vsub.f32 %v371_v23, %v1282_v26  ;;  %v1324_v53 = vsub.f32 %v374_v37, %v1304_v45 }
  0x1e   : > { %268 = vperm.xlu0 %1040, %v258_v5   ;;  %263 = vperm.xlu1 %1041, %v257_v6   ;;  %v458_v44 = vand.u32 4294901760, %v1296_v35  ;;  %v466_v4 = vand.u32 4294901760, %v1327_v55  ;;  %v1337_v5 = vand.u32 4294901760, %v392_v58 }
  0x1f   : > { %v418_v43 = vand.u32 4294901760, %v1290_v31  ;;  %v426_v1 = vand.u32 4294901760, %v1324_v53 }
  0x20   : > { %v459_v52 = vsub.f32 %v1296_v35, %v458_v44 }
  0x21   : > { %v419_v50 = vsub.f32 %v1290_v31, %v418_v43 }
  0x22   : > { %v460_v0 = vand.u32 4294901760, %v459_v52 }
  0x23   : > { %v420_v62 = vand.u32 4294901760, %v419_v50 }
  0x25   : > { %336 = vperm.xlu2 %1042, %v317_v7  }
  0x26   : > { %326 = vperm.xlu0 %1040, %v315_v8   ;;  %331 = vperm.xlu1 %1041, %v316_v9   ;;  %v309_v8 = vld [vmem:[%s1521_s4 + $0x18] sm:$0xff]  ;;  %v314_v9 = vld [vmem:[%s1521_s4 + $0x40] sm:$0xff] }
  0x27   : > { %v380_v17 = vsel %vm369_vm0, %v309_v8, 0 }
  0x28   : > { %v1364_v24 = vand.u32 4294901760, %v380_v17 }
  0x2d   : > { %366 = vperm.xlu2 %1042, %v323_v10  }
  0x2e   : > { %356 = vperm.xlu0 %1040, %v321_v11   ;;  %361 = vperm.xlu1 %1041, %v322_v12   ;;  %v427_v11 = vsub.f32 %v1324_v53, %v426_v1  ;;  %v1352_v12 = vsub.f32 %v377_v56, %v1334_v2 }
  0x35   : > { %351 = vperm.xlu2 %1042, %v320_v13  }
  0x36   : > { %341 = vperm.xlu0 %1040, %v318_v14   ;;  %346 = vperm.xlu1 %1041, %v319_v15   ;;  %v467_v14 = vsub.f32 %v1327_v55, %v466_v4  ;;  %v1358_v15 = vsub.f32 %v392_v58, %v1337_v5 }
  0x38   : > { %v474_v23 = vand.u32 4294901760, %v1358_v15 }
  0x3a   : > { %v475_v32 = vsub.f32 %v1358_v15, %v474_v23 }
  0x6f   : > { %v293_v18 = vpop.permute.xlu2 %292 }
  0x77   : > { %v288_v36 = vpop.permute.xlu2 %287 }
  0x88   : > { %v298_v20 = vpop.permute.xlu1 %297  ;;  %v274_v21 = vpop.permute.xlu0 %273 }
  0x89   : > { %v281_v22 = vmul.f32 %v1043_v16, %v274_v21  ;;  %v434_v21 = vand.u32 4294901760, %v1352_v12 }
  0x8b   : > { %v302_v25 = vadd.f32 %v298_v20, %v281_v22  ;;  %v428_v20 = vand.u32 4294901760, %v427_v11  ;;  %v468_v22 = vand.u32 4294901760, %v467_v14 }
  0x8d   : > { %1045 = vtanh.f32 %v302_v25 }
  0x90   : > { %v269_v29 = vpop.permute.xlu0 %268  ;;  %v264_v30 = vpop.permute.xlu1 %263 }
  0x91   : > { %v280_v33 = vmul.f32 %v1043_v16, %v269_v29  ;;  %v279_v34 = vmul.f32 %v1043_v16, %v264_v30  ;;  %v310_v29 = vld [vmem:[%s1521_s4 + $0x20] sm:$0xff]  ;;  %v435_v30 = vsub.f32 %v1352_v12, %v434_v21 }
  0x93   : > { %v1046_v38 = vpop.eup %1045  ;;  %v301_v39 = vadd.f32 %v293_v18, %v280_v33  ;;  %v300_v40 = vadd.f32 %v288_v36, %v279_v34  ;;  %v395_v18 = vsel %vm369_vm0, %v314_v9, 0  ;;  %v441_v33 = vsub.f32 %v380_v17, %v1364_v24 }
  0x94   : > { %v1300_v42 = vand.u32 4294901760, %v1046_v38  ;;  %v1366_v25 = vand.u32 4294901760, %v395_v18  ;;  %v383_v36 = vsel %vm369_vm0, %v310_v29, 0  ;;  %v436_v37 = vand.u32 4294901760, %v435_v30 }
  0x95   : > { %1047 = vtanh.f32 %v301_v39  ;;  %v442_v39 = vand.u32 4294901760, %v441_v33  ;;  %v448_v41 = vand.u32 4294901760, %v383_v36 }
  0x96   : > { %1049 = vtanh.f32 %v300_v40  ;;  %411 = vmatpush.msra.mxu0 %v1300_v42  ;;  %994 = vmatpush.msra.mxu2 %v1300_v42  ;;  %v503_v46 = vsub.f32 %v1046_v38, %v1300_v42  ;;  %v1377_v34 = vsub.f32 %v395_v18, %v1366_v25  ;;  %v476_v38 = vand.u32 4294901760, %v475_v32 }
  0x98   : > { %v504_v49 = vand.u32 4294901760, %v503_v46  ;;  %v482_v40 = vand.u32 4294901760, %v1377_v34 }
  0x9a   : > { %v505_v54 = vsub.f32 %v503_v46, %v504_v49  ;;  %v483_v48 = vsub.f32 %v1377_v34, %v482_v40 }
  0x9b   : > { %v1048_v57 = vpop.eup %1047 }
  0x9c   : > { %v1050_v59 = vpop.eup %1049  ;;  %v412_v60 = vand.u32 4294901760, %v1048_v57  ;;  %v506_v61 = vand.u32 4294901760, %v505_v54  ;;  %v484_v50 = vand.u32 4294901760, %v483_v48 }
  0x9d   : > { %v1331_v63 = vand.u32 4294901760, %v1050_v59 }
  0x9e   : > { %413 = vmatpush.msra.mxu0 %v412_v60  ;;  %995 = vmatpush.msra.mxu2 %v412_v60  ;;  %v509_v3 = vsub.f32 %v1048_v57, %v412_v60 }
  0x9f   : > { %507 = vmatpush.msra.mxu1 %v506_v61  ;;  %997 = vmatpush.msra.mxu3 %v506_v61  ;;  %v515_v6 = vsub.f32 %v1050_v59, %v1331_v63 }
  0xa0   : > { %415 = vmatpush.msra.mxu0 %v1331_v63  ;;  %996 = vmatpush.msra.mxu2 %v1331_v63  ;;  %v510_v7 = vand.u32 4294901760, %v509_v3 }
  0xa1   : > { %421 = vmatmul.f32.vlgmr.msra.gmra.mxu0 %v420_v62  ;;  %461 = vmatmul.f32.vlgmr.msra.gmra.mxu2 %v460_v0  ;;  %v516_v10 = vand.u32 4294901760, %v515_v6 }
  0xa2   : > { %572 = vmatpush.msrb.mxu2 %v503_v46  ;;  %715 = vmatpush.msrb.mxu0 %v504_v49  ;;  %v511_v13 = vsub.f32 %v509_v3, %v510_v7  ;;  %v443_v46 = vsub.f32 %v441_v33, %v442_v39  ;;  %v449_v49 = vsub.f32 %v383_v36, %v448_v41 }
  0xa3   : > { %v517_v16 = vsub.f32 %v515_v6, %v516_v10 }
  0xa4   : > { %575 = vmatpush.msrb.mxu2 %v509_v3  ;;  %719 = vmatpush.msrb.mxu0 %v510_v7  ;;  %v512_v19 = vand.u32 4294901760, %v511_v13  ;;  %v450_v51 = vand.u32 4294901760, %v449_v49 }
  0xa5   : > { %v518_v28 = vand.u32 4294901760, %v517_v16 }
  0xa6   : > { %578 = vmatpush.msrb.mxu2 %v515_v6  ;;  %723 = vmatpush.msrb.mxu0 %v516_v10  ;;  %v451_v52 = vsub.f32 %v449_v49, %v450_v51 }
  0xa7   : > { %513 = vmatpush.msra.mxu1 %v512_v19  ;;  %998 = vmatpush.msra.mxu3 %v512_v19 }
  0xa8   : > { %v452_v54 = vand.u32 4294901760, %v451_v52 }
  0xa9   : > { %519 = vmatpush.msra.mxu1 %v518_v28  ;;  %999 = vmatpush.msra.mxu3 %v518_v28 }
  0xaa   : > { %429 = vmatmul.f32.gmra.mxu0 %v428_v20  ;;  %469 = vmatmul.f32.gmra.mxu2 %v468_v22 }
  0xab   : > { %521 = vmatmul.f32.vlgmr.msra.gmra.mxu1 %v1282_v26  ;;  %541 = vmatmul.f32.vlgmr.msra.gmra.mxu3 %v1284_v27 }
  0xac   : > { %639 = vmatpush.msrb.mxu3 %v1300_v42  ;;  %775 = vmatpush.msrb.mxu1 %v1300_v42  ;;  %v444_v42 = vand.u32 4294901760, %v443_v46 }
  0xae   : > { %641 = vmatpush.msrb.mxu3 %v412_v60  ;;  %777 = vmatpush.msrb.mxu1 %v412_v60  ;;  %v332_v60 = vpop.permute.xlu1 %331 }
  0xb0   : > { %643 = vmatpush.msrb.mxu3 %v1331_v63  ;;  %779 = vmatpush.msrb.mxu1 %v1331_v63 }
  0xb2   : > { %437 = vmatmul.f32.gmra.mxu0 %v436_v37  ;;  %477 = vmatmul.f32.gmra.mxu2 %v476_v38 }
  0xb3   : > { %525 = vmatmul.f32.gmra.mxu1 %v1304_v45  ;;  %545 = vmatmul.f32.gmra.mxu3 %v1309_v47 }
  0xba   : > { %445 = vmatmul.f32.gmra.mxu0 %v444_v42  ;;  %485 = vmatmul.f32.gmra.mxu2 %v484_v50 }
  0xbb   : > { %529 = vmatmul.f32.gmra.mxu1 %v1334_v2  ;;  %549 = vmatmul.f32.gmra.mxu3 %v1337_v5 }
  0xc2   : > { %453 = vmatmul.f32.gmra.mxu0 %v452_v54  ;;  %581 = vmatmul.f32.vlgmr.msrb.gmra.mxu2 %v1290_v31 }
  0xc3   : > { %533 = vmatmul.f32.gmra.mxu1 %v1364_v24  ;;  %553 = vmatmul.f32.gmra.mxu3 %v1366_v25 }
  0xca   : > { %586 = vmatmul.f32.gmra.mxu2 %v1324_v53  ;;  %725 = vmatmul.f32.vlgmr.msrb.gmra.mxu0 %v1282_v26 }
  0xcb   : > { %537 = vmatmul.f32.gmra.mxu1 %v448_v41  ;;  %647 = vmatmul.f32.vlgmr.msrb.gmra.mxu3 %v418_v43 }
  0xd2   : > { %591 = vmatmul.f32.gmra.mxu2 %v1352_v12  ;;  %729 = vmatmul.f32.gmra.mxu0 %v1304_v45 }
  0xd3   : > { %653 = vmatmul.f32.gmra.mxu3 %v426_v1  ;;  %781 = vmatmul.f32.vlgmr.msrb.gmra.mxu1 %v1282_v26  ;;  %v337_v26 = vpop.permute.xlu2 %336 }
  0xda   : > { %596 = vmatmul.f32.gmra.mxu2 %v441_v33  ;;  %733 = vmatmul.f32.gmra.mxu0 %v1334_v2 }
  0xdb   : > { %659 = vmatmul.f32.gmra.mxu3 %v434_v21  ;;  %785 = vmatmul.f32.gmra.mxu1 %v1304_v45  ;;  %v327_v45 = vpop.permute.xlu0 %326 }
  0xe2   : > { %601 = vmatmul.f32.gmra.mxu2 %v449_v49  ;;  %737 = vmatmul.f32.gmra.mxu0 %v1364_v24 }
  0xe3   : > { %665 = vmatmul.f32.gmra.mxu3 %v442_v39  ;;  %789 = vmatmul.f32.gmra.mxu1 %v1334_v2  ;;  %v357_v61 = vpop.permute.xlu0 %356 }
  0xea   : > { %606 = vmatmul.f32.gmra.mxu2 %v1296_v35  ;;  %741 = vmatmul.f32.gmra.mxu0 %v448_v41  ;;  %v367_v35 = vpop.permute.xlu2 %366 }
  0xeb   : > { %671 = vmatmul.f32.gmra.mxu3 %v450_v51  ;;  %793 = vmatmul.f32.gmra.mxu1 %v1364_v24  ;;  %v342_v7 = vpop.permute.xlu0 %341 }
  0xf2   : > { %611 = vmatmul.f32.gmra.mxu2 %v1327_v55  ;;  %745 = vmatmul.f32.gmra.mxu0 %v1284_v27  ;;  %v352_v53 = vpop.permute.xlu2 %351 }
  0xf3   : > { %677 = vmatmul.f32.gmra.mxu3 %v458_v44  ;;  %797 = vmatmul.f32.gmra.mxu1 %v448_v41 }
  0xfa   : > { %616 = vmatmul.f32.gmra.mxu2 %v1358_v15  ;;  %749 = vmatmul.f32.gmra.mxu0 %v1309_v47 }
  0xfb   : > { %683 = vmatmul.f32.gmra.mxu3 %v466_v4  ;;  %801 = vmatmul.f32.gmra.mxu1 %v1284_v27  ;;  %v362_v4 = vpop.permute.xlu1 %361 }
 0x102   : > { %621 = vmatmul.f32.gmra.mxu2 %v1377_v34  ;;  %753 = vmatmul.f32.gmra.mxu0 %v1337_v5 }
 0x103   : > { %689 = vmatmul.f32.gmra.mxu3 %v474_v23  ;;  %805 = vmatmul.f32.gmra.mxu1 %v1309_v47  ;;  %v347_v16 = vpop.permute.xlu1 %346 }
 0x10a   : > { %757 = vmatmul.f32.gmra.mxu0 %v1366_v25 }
 0x10b   : > { %695 = vmatmul.f32.gmra.mxu3 %v482_v40  ;;  %809 = vmatmul.f32.gmra.mxu1 %v1337_v5 }
 0x113   : > { %813 = vmatmul.f32.gmra.mxu1 %v1366_v25 }
 0x11e   : > { %v422_v31 = vpop.f32.mrf.mxu0 }
 0x11f   : > { %v423_v30 = vadd.f32 %v422_v31, %v327_v45 }
 0x124   : > { %v462_v27 = vpop.f32.mrf.mxu2 }
 0x125   : > { %v463_v55 = vadd.f32 %v462_v27, %v352_v53 }
 0x127   : > { %v430_v43 = vpop.f32.mrf.mxu0 }
 0x128   : > { %v522_v44 = vpop.f32.mrf.mxu1  ;;  %v431_v29 = vadd.f32 %v430_v43, %v332_v60 }
 0x129   : > { %v523_v33 = vadd.f32 %v522_v44, %v423_v30 }
 0x12d   : > { %v470_v56 = vpop.f32.mrf.mxu2 }
 0x12e   : > { %v542_v57 = vpop.f32.mrf.mxu3  ;;  %v471_v62 = vadd.f32 %v470_v56, %v357_v61 }
 0x12f   : > { %v1431_v58 = vadd.f32 %v542_v57, %v463_v55  ;;  %v438_v47 = vpop.f32.mrf.mxu0 }
 0x130   : > { %v526_v59 = vpop.f32.mrf.mxu1  ;;  %v439_v46 = vadd.f32 %v438_v47, %v337_v26 }
 0x131   : > { %v527_v32 = vadd.f32 %v526_v59, %v431_v29 }
 0x135   : > { %v478_v63 = vpop.f32.mrf.mxu2 }
 0x136   : > { %v546_v0 = vpop.f32.mrf.mxu3  ;;  %v479_v5 = vadd.f32 %v478_v63, %v362_v4 }
 0x137   : > { %v1433_v1 = vadd.f32 %v546_v0, %v471_v62  ;;  %v446_v2 = vpop.f32.mrf.mxu0 }
 0x138   : > { %v530_v3 = vpop.f32.mrf.mxu1  ;;  %v447_v9 = vadd.f32 %v446_v2, %v342_v7 }
 0x139   : > { %v531_v49 = vadd.f32 %v530_v3, %v439_v46 }
 0x13d   : > { %v486_v6 = vpop.f32.mrf.mxu2 }
 0x13e   : > { %v550_v8 = vpop.f32.mrf.mxu3  ;;  %v487_v14 = vadd.f32 %v486_v6, %v367_v35 }
 0x13f   : > { %v1435_v10 = vadd.f32 %v550_v8, %v479_v5  ;;  %v454_v11 = vpop.f32.mrf.mxu0 }
 0x140   : > { %v534_v12 = vpop.f32.mrf.mxu1  ;;  %v455_v18 = vadd.f32 %v454_v11, %v347_v16 }
 0x141   : > { %v1437_v13 = vadd.f32 %v534_v12, %v447_v9 }
 0x145   : > { %v582_v15 = vpop.f32.mrf.mxu2 }
 0x146   : > { %v554_v17 = vpop.f32.mrf.mxu3  ;;  %v583_v38 = vadd.f32 %v582_v15, %v523_v33 }
 0x147   : > { %v1439_v19 = vadd.f32 %v554_v17, %v487_v14  ;;  %v726_v20 = vpop.f32.mrf.mxu0 }
 0x148   : > { %v538_v21 = vpop.f32.mrf.mxu1 }
 0x149   : > { %v1441_v22 = vadd.f32 %v538_v21, %v455_v18 }
 0x14d   : > { %v587_v23 = vpop.f32.mrf.mxu2 }
 0x14e   : > { %v648_v24 = vpop.f32.mrf.mxu3  ;;  %v588_v34 = vadd.f32 %v587_v23, %v527_v32 }
 0x14f   : > { %v730_v25 = vpop.f32.mrf.mxu0  ;;  %v649_v48 = vadd.f32 %v648_v24, %v583_v38 }
 0x150   : > { %v782_v28 = vpop.f32.mrf.mxu1 }
 0x151   : > { %v727_v50 = vadd.f32 %v726_v20, %v649_v48 }
 0x153   : > { %v783_v44 = vadd.f32 %v782_v28, %v727_v50 }
 0x155   : > { %v592_v36 = vpop.f32.mrf.mxu2 }
 0x156   : > { %v654_v37 = vpop.f32.mrf.mxu3  ;;  %v593_v51 = vadd.f32 %v592_v36, %v531_v49 }
 0x157   : > { %v655_v39 = vadd.f32 %v654_v37, %v588_v34  ;;  %v734_v40 = vpop.f32.mrf.mxu0 }
 0x158   : > { %v786_v41 = vpop.f32.mrf.mxu1 }
 0x159   : > { %v731_v42 = vadd.f32 %v730_v25, %v655_v39 }
 0x15b   : > { %v787_v35 = vadd.f32 %v786_v41, %v731_v42 }
 0x15d   : > { %v597_v52 = vpop.f32.mrf.mxu2  ;;  %v817_v53 = vmax.f32 %v783_v44, %v787_v35 }
 0x15e   : > { %v660_v54 = vpop.f32.mrf.mxu3  ;;  %v598_v30 = vadd.f32 %v597_v52, %v1437_v13 }
 0x15f   : > { %v661_v27 = vadd.f32 %v660_v54, %v593_v51  ;;  %v738_v31 = vpop.f32.mrf.mxu0 }
 0x160   : > { %v790_v43 = vpop.f32.mrf.mxu1 }
 0x161   : > { %v735_v45 = vadd.f32 %v734_v40, %v661_v27 }
 0x163   : > { %v791_v55 = vadd.f32 %v790_v43, %v735_v45  ;;  %v1044_v43 = vld [vmem:[%s256_s28] ss:$0 sm:$0xff] }
 0x165   : > { %v818_v56 = vmax.f32 %v817_v53, %v791_v55  ;;  %v602_v57 = vpop.f32.mrf.mxu2 }
 0x166   : > { %v666_v59 = vpop.f32.mrf.mxu3  ;;  %v603_v54 = vadd.f32 %v602_v57, %v1441_v22 }
 0x167   : > { %v819_v60 = vrot.slane %v818_v56, 4  ;;  %v1443_v26 = vpop.f32.mrf.mxu0  ;;  %v667_v37 = vadd.f32 %v666_v59, %v598_v30 }
 0x168   : > { %v794_v47 = vpop.f32.mrf.mxu1 }
 0x169   : > { %v820_v61 = vmax.f32 %v818_v56, %v819_v60  ;;  %v739_v48 = vadd.f32 %v738_v31, %v667_v37 }
 0x16b   : > { %v821_v62 = vrot.slane %v820_v61, 2  ;;  %v795_v27 = vadd.f32 %v794_v47, %v739_v48 }
 0x16d   : > { %v822_v63 = vmax.f32 %v820_v61, %v821_v62  ;;  %v1445_v0 = vpop.f32.mrf.mxu2  ;;  %v860_v59 = vsub.f32 %v1044_v43, %v795_v27 }
 0x16e   : > { %v672_v2 = vpop.f32.mrf.mxu3 }
 0x16f   : > { %v823_v3 = vrot.slane %v822_v63, 1  ;;  %v1449_v5 = vpop.f32.mrf.mxu0  ;;  %v673_v45 = vadd.f32 %v672_v2, %v603_v54 }
 0x170   : > { %v1447_v4 = vpop.f32.mrf.mxu1 }
 0x171   : > { %v824_v6 = vmax.f32 %v822_v63, %v823_v3  ;;  %v743_v57 = vadd.f32 %v1443_v26, %v673_v45  ;;  %v608_v63 = vadd.f32 %v1445_v0, %v1431_v58 }
 0x173   : > { %v1451_v7 = vsub.f32 %v783_v44, %v824_v6  ;;  %v1453_v8 = vsub.f32 %v787_v35, %v824_v6  ;;  %v1455_v9 = vsub.f32 %v791_v55, %v824_v6 }
 0x175   : > { %v828_v11 = vmul.f32 1.442695, %v1451_v7  ;;  %v830_v12 = vmul.f32 1.442695, %v1453_v8  ;;  %v832_v14 = vmul.f32 1.442695, %v1455_v9  ;;  %v612_v15 = vpop.f32.mrf.mxu2 }
 0x176   : > { %v678_v16 = vpop.f32.mrf.mxu3  ;;  %v613_v21 = vadd.f32 %v612_v15, %v1433_v1 }
 0x177   : > { %1051 = vpow2.f32 %v828_v11  ;;  %v750_v18 = vpop.f32.mrf.mxu0  ;;  %v679_v11 = vadd.f32 %v678_v16, %v608_v63 }
 0x178   : > { %1053 = vpow2.f32 %v830_v12  ;;  %v1460_v17 = vpop.f32.mrf.mxu1  ;;  %v799_v12 = vadd.f32 %v1447_v4, %v743_v57 }
 0x179   : > { %1055 = vpow2.f32 %v832_v14 }
 0x17d   : > { %v1052_v20 = vpop.eup %1051  ;;  %v617_v32 = vpop.f32.mrf.mxu2 }
 0x17e   : > { %v1054_v23 = vpop.eup %1053  ;;  %v684_v24 = vpop.f32.mrf.mxu3  ;;  %v618_v1 = vadd.f32 %v617_v32, %v1435_v10 }
 0x17f   : > { %v834_v25 = vadd.f32 %v1054_v23, %v1052_v20  ;;  %v685_v28 = vadd.f32 %v684_v24, %v613_v21  ;;  %v1056_v29 = vpop.eup %1055  ;;  %v754_v40 = vpop.f32.mrf.mxu0  ;;  %v747_v20 = vadd.f32 %v1449_v5, %v679_v11  ;;  %v861_v23 = vsub.f32 %v1044_v43, %v799_v12 }
 0x180   : > { %v806_v33 = vpop.f32.mrf.mxu1 }
 0x181   : > { %v835_v34 = vadd.f32 %v1056_v29, %v834_v25  ;;  %v751_v36 = vadd.f32 %v750_v18, %v685_v28  ;;  %v803_v28 = vadd.f32 %v1460_v17, %v747_v20 }
 0x183   : > { %v836_v38 = vrot.slane %v835_v34, 4  ;;  %v1464_v39 = vadd.f32 %v806_v33, %v751_v36  ;;  %v862_v4 = vsub.f32 %v1044_v43, %v803_v28 }
 0x185   : > { %v837_v41 = vadd.f32 %v836_v38, %v835_v34  ;;  %v848_v46 = vsub.f32 0.0, %v1464_v39  ;;  %v622_v10 = vpop.f32.mrf.mxu2 }
 0x186   : > { %v690_v49 = vpop.f32.mrf.mxu3  ;;  %v623_v53 = vadd.f32 %v622_v10, %v1439_v19 }
 0x187   : > { %v838_v42 = vrot.slane %v837_v41, 2  ;;  %v851_v50 = vmul.f32 1.442695, %v848_v46  ;;  %v691_v13 = vadd.f32 %v690_v49, %v618_v1  ;;  %v758_v61 = vpop.f32.mrf.mxu0 }
 0x188   : > { %v810_v51 = vpop.f32.mrf.mxu1 }
 0x189   : > { %v839_v52 = vadd.f32 %v838_v42, %v837_v41  ;;  %1057 = vpow2.f32 %v851_v50  ;;  %v755_v35 = vadd.f32 %v754_v40, %v691_v13 }
 0x18b   : > { %v840_v44 = vrot.slane %v839_v52, 1  ;;  %v811_v31 = vadd.f32 %v810_v51, %v755_v35 }
 0x18d   : > { %v849_v55 = vsub.f32 0.0, %v811_v31  ;;  %v841_v56 = vadd.f32 %v840_v44, %v839_v52 }
 0x18e   : > { %v696_v60 = vpop.f32.mrf.mxu3 }
 0x18f   : > { %v1058_v22 = vpop.eup %1057  ;;  %v853_v47 = vmul.f32 1.442695, %v849_v55  ;;  %v697_v62 = vadd.f32 %v696_v60, %v623_v53 }
 0x190   : > { %v863_v3 = vmul.f32 %v1058_v22, %v860_v59  ;;  %v814_v6 = vpop.f32.mrf.mxu1 }
 0x191   : > { %1059 = vpow2.f32 %v853_v47  ;;  %v759_v2 = vadd.f32 %v758_v61, %v697_v62 }
 0x192   : > { %1061 = vlog2.f32 %v841_v56  ;;  %v866_v19 = vmul.f32 %v863_v3, %v863_v3 }
 0x193   : > { %v815_v14 = vadd.f32 %v814_v6, %v759_v2 }
 0x194   : > { %v869_v15 = vmul.f32 -0.5, %v866_v19 }
 0x195   : > { %v850_v18 = vsub.f32 0.0, %v815_v14 }
 0x196   : > { %v989_v26 = vadd.f32 -0.9189385, %v869_v15 }
 0x197   : > { %v1060_v21 = vpop.eup %1059  ;;  %v855_v24 = vmul.f32 1.442695, %v850_v18 }
 0x198   : > { %v1062_v25 = vpop.eup %1061  ;;  %v875_v58 = vsub.f32 %v989_v26, %v1464_v39  ;;  %v864_v0 = vmul.f32 %v1060_v21, %v861_v23 }
 0x199   : > { %1063 = vpow2.f32 %v855_v24  ;;  %v843_v16 = vmul.f32 0.6931472, %v1062_v25 }
 0x19a   : > { %v867_v29 = vmul.f32 %v864_v0, %v864_v0 }
 0x19b   : > { %v844_v33 = vsub.f32 %v1451_v7, %v843_v16  ;;  %v845_v36 = vsub.f32 %v1453_v8, %v843_v16  ;;  %v846_v17 = vsub.f32 %v1455_v9, %v843_v16 }
 0x19c   : > { %v870_v30 = vmul.f32 -0.5, %v867_v29 }
 0x19d   : > { %v878_v40 = vadd.f32 %v875_v58, %v844_v33 }
 0x19e   : > { %v990_v34 = vadd.f32 -0.9189385, %v870_v30 }
 0x19f   : > { %v1064_v32 = vpop.eup %1063 }
 0x1a0   : > { %v865_v5 = vmul.f32 %v1064_v32, %v862_v4  ;;  %v876_v37 = vsub.f32 %v990_v34, %v811_v31 }
 0x1a2   : > { %v868_v38 = vmul.f32 %v865_v5, %v865_v5  ;;  %v879_v41 = vadd.f32 %v876_v37, %v845_v36 }
 0x1a4   : > { %v871_v39 = vmul.f32 -0.5, %v868_v38  ;;  %v881_v1 = vmax.f32 %v878_v40, %v879_v41 }
 0x1a6   : > { %v991_v46 = vadd.f32 -0.9189385, %v871_v39 }
 0x1a8   : > { %v877_v48 = vsub.f32 %v991_v46, %v815_v14 }
 0x1aa   : > { %v880_v49 = vadd.f32 %v877_v48, %v846_v17 }
 0x1ac   : > { %v882_v42 = vmax.f32 %v881_v1, %v880_v49 }
 0x1ae   : > { %v883_v50 = vrot.slane %v882_v42, 4 }
 0x1b0   : > { %v884_v13 = vmax.f32 %v882_v42, %v883_v50 }
 0x1b2   : > { %v885_v51 = vrot.slane %v884_v13, 2 }
 0x1b4   : > { %v886_v7 = vmax.f32 %v884_v13, %v885_v51 }
 0x1b6   : > { %v887_v52 = vrot.slane %v886_v7, 1 }
 0x1b8   : > { %v888_v54 = vmax.f32 %v886_v7, %v887_v52 }
 0x1ba   : > { %v889_v35 = vsub.f32 %v878_v40, %v888_v54  ;;  %v890_v8 = vsub.f32 %v879_v41, %v888_v54  ;;  %v891_v27 = vsub.f32 %v880_v49, %v888_v54 }
 0x1bc   : > { %v892_v43 = vmul.f32 1.442695, %v889_v35  ;;  %v894_v10 = vmul.f32 1.442695, %v890_v8  ;;  %v896_v44 = vmul.f32 1.442695, %v891_v27 }
 0x1be   : > { %1065 = vpow2.f32 %v892_v43 }
 0x1bf   : > { %1067 = vpow2.f32 %v894_v10 }
 0x1c0   : > { %1069 = vpow2.f32 %v896_v44 }
 0x1c4   : > { %v1066_v9 = vpop.eup %1065 }
 0x1c5   : > { %v1068_v45 = vpop.eup %1067 }
 0x1c6   : > { %v898_v31 = vadd.f32 %v1068_v45, %v1066_v9  ;;  %v1070_v53 = vpop.eup %1069 }
 0x1c8   : > { %v899_v55 = vadd.f32 %v1070_v53, %v898_v31 }
 0x1ca   : > { %v900_v56 = vrot.slane %v899_v55, 4 }
 0x1cc   : > { %v901_v59 = vadd.f32 %v900_v56, %v899_v55 }
 0x1ce   : > { %v902_v60 = vrot.slane %v901_v59, 2 }
 0x1d0   : > { %v903_v61 = vadd.f32 %v902_v60, %v901_v59 }
 0x1d2   : > { %v904_v22 = vrot.slane %v903_v61, 1 }
 0x1d4   : > { %v905_v57 = vadd.f32 %v904_v22, %v903_v61 }
 0x1d6   : > { %1071 = vlog2.f32 %v905_v57 }
 0x1dc   : > { %v1072_v47 = vpop.eup %1071 }
 0x1dd   : > { %v907_v62 = vmul.f32 0.6931472, %v1072_v47 }
 0x1df   : > { %v908_v63 = vadd.f32 %v907_v62, %v888_v54 }
 0x1e1   : > { %v909_v3 = vsub.f32 0.0, %v908_v63 }
 0x1e3   : > { %910 = vst [vmem:[%s250_s13] sm:$0x1] %v909_v3 }
 0x1e4   : > { %1100 = shalt.err (!%p1097_p3)
}
 0x1e5   : > { %1000 = dma.vmem_to_hbm [thread:$0]  (%p1211_p5), %s923_s14, 16, %s925_s16, %s912_s17  }
 0x1e6 PF: > { %p1006_p4 = scmp.ge.s32.totalorder %s1135_s24, 2  ;;  %s936_s9 = sand.u32 1, %s1123_s21  }
 0x1e7   : > { %s937_s15 = scalar_lea.sflag [#allocation3], %s936_s9 }
 0x1e8   : > { %p1003_p7 = pnand %p1006_p4, %p1215_p6 }
 0x1ea   : > { %p1004_p8 = pneg %p1003_p7 }
 0x1ec   : > { %1118 = dma.done.wait (%p1004_p8), %s937_s15, 16  }
 0x1ed   : > { %1120 = vsyncadd (%p1004_p8), %s937_s15, 4294967280  ;;  %p16_p9 = scmp.ge.s32.totalorder %s1198_s27, 4   ;;  %s1526_s21 = smov %s1127_s22 }
 0x1ee   : > { %s1527_s22 = smov %s1131_s23  ;;  %s1528_s23 = smov %s1209_s30 }
 0x1ef   : > { %s1529_s24 = smov %s1198_s27  ;;  %18 = sbr.rel (!%p16_p9) target bundleno = 3 (0x3), region = 82 }
 0x1f4   :  { %942 = vsyncpa [#allocation3], 1 }
 0x1f5   :  { %944 = vsyncpa [#allocation3 + $0x1], 1 }

</bundles_post_ra>
